<compile_context>
chip_gen: v5e
topology: v5e:2x2
jax: 0.10.0
libtpu: 0.0.40
codegen_flags: <defaults>
</compile_context>

<pallas_src>
import jax
import jax.numpy as jnp
from jax.experimental import pallas as pl
from jax.experimental.pallas import tpu as pltpu


def _round_up(n, m):
    return (n + m - 1) // m * m


def _mlp_sigmoid_kernel(x_ref, w1_ref, b1_ref, w2_ref, b2_ref, o_ref):
    # Pre-transposed weights feed the MXU directly (no in-kernel transpose);
    # bias-add + sigmoid run in f32 on the accumulator (VPU + EUP).
    x = x_ref[...]                                                   # (TM, I)
    h = jnp.dot(x, w1_ref[...], preferred_element_type=jnp.float32)  # (TM, H)
    h = jax.nn.sigmoid(h + b1_ref[...])                              # f32
    h = h.astype(w2_ref.dtype)                                       # match W2 stream dtype
    y = jnp.dot(h, w2_ref[...], preferred_element_type=jnp.float32)  # (TM, O)
    o_ref[...] = jax.nn.sigmoid(y + b2_ref[...]).astype(o_ref.dtype)


def prepare_classifier_params(w1, b1, w2, b2, compute_dtype=jnp.float32):
    """Hoist the per-call prep: call ONCE at model init.

    PyTorch Linear convention in: w1 (H, I), b1 (H,), w2 (O, H), b2 (O,).
    Returns weights pre-transposed to (in, out) in `compute_dtype` (f32 or
    bf16) and biases as (1, n) f32 rows. No feature-dim padding.
    """
    w1t = jnp.asarray(w1, jnp.float32).T.astype(compute_dtype)   # (I, H)
    w2t = jnp.asarray(w2, jnp.float32).T.astype(compute_dtype)   # (H, O)
    b1r = jnp.asarray(b1, jnp.float32).reshape(1, -1)            # (1, H)
    b2r = jnp.asarray(b2, jnp.float32).reshape(1, -1)            # (1, O)
    return w1t, b1r, w2t, b2r


def _forward_whole_block(x, w1t, b1r, w2t, b2r):
    """Tiny-batch path: no grid, everything is one VMEM-resident block (blocks
    equal the full arrays, so no pipeline prologue/epilogue, no padding)."""
    B = x.shape[0]
    O = w2t.shape[1]
    return pl.pallas_call(
        _mlp_sigmoid_kernel,
        out_shape=jax.ShapeDtypeStruct((B, O), jnp.float32),
        in_specs=[pl.BlockSpec(memory_space=pltpu.MemorySpace.VMEM)
                  for _ in range(5)],
        out_specs=pl.BlockSpec(memory_space=pltpu.MemorySpace.VMEM),
    )(x, w1t, b1r, w2t, b2r)


def _forward_batch_tiled(x, w1t, b1r, w2t, b2r, tm):
    """Large-batch path: tile only the batch dim; weights/biases use constant
    index_maps (VMEM-resident across tiles); batch axis is "parallel" so v7x
    shards tiles across its two TensorCores. Ragged last tile is masked."""
    B, I = x.shape
    H, O = w2t.shape
    # Feature-dim blocks equal the full array dims, so only the batch tile is
    # subject to the (8,128) divisibility rule.
    assert tm % 8 == 0, "batch tile must be a sublane multiple"
    num_tiles = pl.cdiv(B, tm)
    return pl.pallas_call(
        _mlp_sigmoid_kernel,
        out_shape=jax.ShapeDtypeStruct((B, O), jnp.float32),
        grid_spec=pltpu.PrefetchScalarGridSpec(
            num_scalar_prefetch=0,
            grid=(num_tiles,),
            in_specs=[
                pl.BlockSpec((tm, I), lambda i: (i, 0)),   # x: lane dim = full I
                pl.BlockSpec((I, H), lambda i: (0, 0)),    # resident W1^T
                pl.BlockSpec((1, H), lambda i: (0, 0)),    # resident b1
                pl.BlockSpec((H, O), lambda i: (0, 0)),    # resident W2^T
                pl.BlockSpec((1, O), lambda i: (0, 0)),    # resident b2
            ],
            out_specs=pl.BlockSpec((tm, O), lambda i: (i, 0)),
        ),
        compiler_params=pltpu.CompilerParams(
            dimension_semantics=("parallel",)),
    )(x, w1t, b1r, w2t, b2r)


def classifier_forward(x, params, *, tm=512):
    """Forward pass of `Classifier`.

    x: (B, inodes). `params` comes from prepare_classifier_params (call once).
    Returns (B, onodes) f32. No wrapper-side pad or post-kernel slice copies.
    """
    w1t, b1r, w2t, b2r = params
    B, I = x.shape
    assert w1t.shape[0] == I and w2t.shape[0] == w1t.shape[1]

    x = x.astype(w1t.dtype)
    sublane = 16 if w1t.dtype == jnp.bfloat16 else 8

    if B < 256:
        # Small batch: single whole-VMEM block, skip the pipeline machinery.
        return _forward_whole_block(x, w1t, b1r, w2t, b2r)

    # Cap the tile at ceil(B/2) (sublane-rounded) so the "parallel" batch grid
    # always has >= 2 steps (v7x: keeps both TensorCores busy). Never round B
    # itself up to a tile multiple; pl.cdiv + masked boundary blocks handle it.
    tm_eff = max(sublane, min(tm, _round_up(pl.cdiv(B, 2), sublane)))
    return _forward_batch_tiled(x, w1t, b1r, w2t, b2r, tm_eff)


if __name__ == "__main__":
    # Shapes consistent with the module: Classifier(inputnodes=32,
    # hiddennodes=32, outputnodes=16, lr=...), batch of 2 queries.
    B, INODES, HNODES, ONODES = 2, 32, 32, 16

    key = jax.random.PRNGKey(0)
    kx, kw1, kb1, kw2, kb2, kxb = jax.random.split(key, 6)

    x = jax.random.normal(kx, (B, INODES), dtype=jnp.float32)

    # PyTorch Linear init convention: W=(out,in), b=(out,), U(-1/sqrt(in), 1/sqrt(in)).
    lim1 = 1.0 / jnp.sqrt(INODES)
    w1 = jax.random.uniform(kw1, (HNODES, INODES), jnp.float32, -lim1, lim1)
    b1 = jax.random.uniform(kb1, (HNODES,), jnp.float32, -lim1, lim1)
    lim2 = 1.0 / jnp.sqrt(HNODES)
    w2 = jax.random.uniform(kw2, (ONODES, HNODES), jnp.float32, -lim2, lim2)
    b2 = jax.random.uniform(kb2, (ONODES,), jnp.float32, -lim2, lim2)

    def reference(xx):
        h = jax.nn.sigmoid(xx @ w1.T + b1)
        return jax.nn.sigmoid(h @ w2.T + b2)

    # Params are prepared ONCE and reused across calls (hoisted prep).
    params_f32 = prepare_classifier_params(w1, b1, w2, b2)

    # 1) Tiny-batch path (no grid, whole VMEM block, no padding anywhere).
    out = classifier_forward(x, params_f32)
    jax.block_until_ready(out)
    assert out.shape == (B, ONODES)
    assert jnp.allclose(out, reference(x), atol=1e-5), "tiny-batch mismatch"

    # 2) Batch-tiled path (grid over batch only, >= 2 parallel tiles,
    #    weights resident, unpadded x / output).
    BB = 640
    xb = jax.random.normal(kxb, (BB, INODES), dtype=jnp.float32)
    outb = classifier_forward(xb, params_f32)   # 2 tiles of 320 rows
    jax.block_until_ready(outb)
    assert outb.shape == (BB, ONODES)
    assert jnp.allclose(outb, reference(xb), atol=1e-5), "batch-tiled mismatch"

    # 3) Optional bf16 streaming mode (halves HBM bytes; f32 accumulation).
    params_bf16 = prepare_classifier_params(w1, b1, w2, b2,
                                            compute_dtype=jnp.bfloat16)
    outbf = classifier_forward(xb, params_bf16)
    jax.block_until_ready(outbf)
    assert outbf.shape == (BB, ONODES)
    assert jnp.allclose(outbf, reference(xb), atol=5e-2), "bf16 path mismatch"

    print("KERNEL_OK")
</pallas_src>

<mosaic_0001>
module attributes {stable_mosaic.version = 11 : i64} {
  func.func @_mlp_sigmoid_kernel(%arg0: memref<2x32xf32, #tpu.memory_space<vmem>>, %arg1: memref<32x32xf32, #tpu.memory_space<vmem>>, %arg2: memref<1x32xf32, #tpu.memory_space<vmem>>, %arg3: memref<32x16xf32, #tpu.memory_space<vmem>>, %arg4: memref<1x16xf32, #tpu.memory_space<vmem>>, %arg5: memref<2x16xf32, #tpu.memory_space<vmem>>) attributes {dimension_semantics = [], scalar_prefetch = 0 : i64, scratch_operands = 0 : i64, tpu.core_type = #tpu.core_type<tc>} {
    %c0 = arith.constant 0 : index
    %c0_0 = arith.constant 0 : index
    %0 = vector.load %arg0[%c0, %c0_0] : memref<2x32xf32, #tpu.memory_space<vmem>>, vector<2x32xf32>
    %c0_1 = arith.constant 0 : index
    %c0_2 = arith.constant 0 : index
    %1 = vector.load %arg1[%c0_1, %c0_2] : memref<32x32xf32, #tpu.memory_space<vmem>>, vector<32x32xf32>
    %cst = arith.constant dense<0.000000e+00> : vector<2x32xf32>
    %2 = tpu.matmul %0, %1, %cst {dimension_numbers = #tpu.dot_dimension_numbers<[1], [0], [0], [1], [0, 0, 1, 1], [], []>} : vector<2x32xf32>, vector<32x32xf32>, vector<2x32xf32> -> vector<2x32xf32>
    %c0_3 = arith.constant 0 : index
    %c0_4 = arith.constant 0 : index
    %3 = vector.load %arg2[%c0_3, %c0_4] : memref<1x32xf32, #tpu.memory_space<vmem>>, vector<1x32xf32>
    %4 = vector.broadcast %3 : vector<1x32xf32> to vector<2x32xf32>
    %5 = arith.addf %2, %4 : vector<2x32xf32>
    %6 = arith.negf %5 : vector<2x32xf32>
    %7 = math.exp %6 : vector<2x32xf32>
    %cst_5 = arith.constant 1.000000e+00 : f32
    %8 = vector.broadcast %cst_5 : f32 to vector<2x32xf32>
    %9 = arith.addf %8, %7 : vector<2x32xf32>
    %10 = arith.divf %8, %9 : vector<2x32xf32>
    %c0_6 = arith.constant 0 : index
    %c0_7 = arith.constant 0 : index
    %11 = vector.load %arg3[%c0_6, %c0_7] : memref<32x16xf32, #tpu.memory_space<vmem>>, vector<32x16xf32>
    %cst_8 = arith.constant dense<0.000000e+00> : vector<2x16xf32>
    %12 = tpu.matmul %10, %11, %cst_8 {dimension_numbers = #tpu.dot_dimension_numbers<[1], [0], [0], [1], [0, 0, 1, 1], [], []>} : vector<2x32xf32>, vector<32x16xf32>, vector<2x16xf32> -> vector<2x16xf32>
    %c0_9 = arith.constant 0 : index
    %c0_10 = arith.constant 0 : index
    %13 = vector.load %arg4[%c0_9, %c0_10] : memref<1x16xf32, #tpu.memory_space<vmem>>, vector<1x16xf32>
    %14 = vector.broadcast %13 : vector<1x16xf32> to vector<2x16xf32>
    %15 = arith.addf %12, %14 : vector<2x16xf32>
    %16 = arith.negf %15 : vector<2x16xf32>
    %17 = math.exp %16 : vector<2x16xf32>
    %cst_11 = arith.constant 1.000000e+00 : f32
    %18 = vector.broadcast %cst_11 : f32 to vector<2x16xf32>
    %19 = arith.addf %18, %17 : vector<2x16xf32>
    %20 = arith.divf %18, %19 : vector<2x16xf32>
    %c0_12 = arith.constant 0 : index
    %c0_13 = arith.constant 0 : index
    %21 = vector.load %arg5[%c0_12, %c0_13] : memref<2x16xf32, #tpu.memory_space<vmem>>, vector<2x16xf32>
    tpu.vector_store %arg5[%c0_12, %c0_13], %20 {strides = array<i32>} : memref<2x16xf32, #tpu.memory_space<vmem>>, vector<2x16xf32>,
    return
  }
}

</mosaic_0001>

<bundles_post_ra>
// kernel: tpu_custom_call.1
= control target key start
LH: loop header
LB: loop body
LE: loop exit
PB: predicated region body
PF: predicated region fallthrough
CT: control target
= control target key end

     0   :  { %s251_s0 = inlined_call_operand.vmem [shape: f32[2,32], index: 0, kind: input, shape index: {}]   ;;  %s252_s1 = inlined_call_operand.vmem [shape: f32[32,32], index: 1, kind: input, shape index: {}]   ;;  %s253_s2 = inlined_call_operand.vmem [shape: f32[1,32], index: 2, kind: input, shape index: {}]   ;;  %s254_s3 = inlined_call_operand.vmem [shape: f32[32,16], index: 3, kind: input, shape index: {}]   ;;  %s255_s4 = inlined_call_operand.vmem [shape: f32[1,16], index: 4, kind: input, shape index: {}]   ;;  %s256_s5 = inlined_call_operand.hbm [shape: f32[2,16], index: 5, kind: output, shape index: {}]  }
   0x1   :  { %v25_v0 = vld [vmem:[%s252_s1 + $0x18] sm:$0xff]  ;;  %v24_v1 = vld [vmem:[%s252_s1 + $0x10] sm:$0xff]  ;;  %v23_v2 = vld [vmem:[%s252_s1 + $0x8] sm:$0xff] }
   0x2   :  { %46 = vmatpush.msra.mxu0 %v25_v0 }
   0x3   :  { %10 = vsyncpa [#allocation3], 0  ;;  %v22_v3 = vld [vmem:[%s252_s1] sm:$0xff]  ;;  %vm30_vm0 = vcmask 261120   ;;  %v76_v5 = vld [vmem:[%s254_s3 + $0x18] sm:$0xff]  ;;  %s182_s11 = smov [#allocation2]  }
   0x4   :  { %47 = vmatpush.msra.mxu0 %v24_v1  ;;  %v21_v4 = vld [vmem:[%s251_s0] sm:$0x3]  ;;  %v75_v6 = vld [vmem:[%s254_s3 + $0x10] sm:$0xff]  ;;  %96 = vmatpush.msra.mxu1 %v76_v5  ;;  %v74_v7 = vld [vmem:[%s254_s3 + $0x8] sm:$0xff]  ;;  %s130_s12 = sshll.u32 %s182_s11, 4  ;;  %vm123_vm8 = vcmask 123904   ;;  %s131_s12 = int_to_ptr.vmem [resolvable:$true] %s130_s12 }
   0x5   :  { %v73_v8 = vld [vmem:[%s254_s3] sm:$0xff] }
   0x6   :  { %48 = vmatpush.msra.mxu0 %v23_v2  ;;  %97 = vmatpush.msra.mxu1 %v75_v6  ;;  %v146_v9 = vld [vmem:[%s253_s2] ss:$0 sm:$0xff] }
   0x7   :  { %v147_v25 = vld [vmem:[%s255_s4] ss:$0 sm:$0xff]  ;;  %s132_s4 = sshll.u32 %s256_s5, 4  ;;  %s133_s4 = int_to_ptr.hbm [resolvable:$true] %s132_s4 }
   0x8   :  { %49 = vmatpush.msra.mxu0 %v22_v3  ;;  %98 = vmatpush.msra.mxu1 %v74_v7 }
   0x9   :  { %141 = vmatmul.msk.f32.vlgmr.msra.gmra.mxu0 %vm30_vm0, %v21_v4 }
   0xa   :  { %99 = vmatpush.msra.mxu1 %v73_v8 }
  0x86   :  { %v51_v10 = vpop.f32.mrf.mxu0 }
  0x87   :  { %v52_v11 = vadd.f32 %v146_v9, %v51_v10 }
  0x89   :  { %v142_v12 = vmul.f32 -1.442695, %v52_v11 }
  0x8b   :  { %148 = vpow2.f32 %v142_v12 }
  0x91   :  { %v149_v13 = vpop.eup %148 }
  0x92   :  { %v57_v14 = vadd.f32 1.0, %v149_v13 }
  0x94   :  { %150 = vrcp.f32 %v57_v14  ;;  %v69_v18 = vand.u32 2147483648, %v57_v14  ;;  %v67_v20 = vand.u32 2147483647, %v57_v14  ;;  %vm63_vm2 = vweird.f32 %v57_v14 }
  0x96   :  { %v70_v22 = vor.u32 1.1754944e-38, %v69_v18  ;;  %vm68_vm4 = vcmp.eq.f32.partialorder %v67_v20, 8.507059e+37 }
  0x9a   :  { %v151_v15 = vpop.eup %150 }
  0x9b   :  { %v59_v16 = vmul.f32 %v151_v15, %v57_v14  ;;  %vm64_vm1 = vweird.f32 %v151_v15 }
  0x9c   :  { %vm65_vm3 = vmor %vm63_vm2, %vm64_vm1 }
  0x9d   :  { %v60_v17 = vsub.f32 1.0, %v59_v16 }
  0x9f   :  { %v61_v19 = vmul.f32 %v151_v15, %v60_v17 }
  0xa1   :  { %v62_v21 = vadd.f32 %v151_v15, %v61_v19 }
  0xa3   :  { %v66_v23 = vsel %vm65_vm3, %v151_v15, %v62_v21 }
  0xa4   :  { %v71_v24 = vsel %vm68_vm4, %v70_v22, %v66_v23 }
  0xa5   :  { %143 = vmatmul.msk.f32.vlgmr.msra.gmra.mxu1 %vm30_vm0, %v71_v24 }
 0x122   :  { %v101_v26 = vpop.f32.mrf.mxu1 }
 0x123   :  { %v102_v27 = vadd.f32 %v147_v25, %v101_v26 }
 0x125   :  { %v144_v28 = vmul.f32 -1.442695, %v102_v27 }
 0x127   :  { %152 = vpow2.f32 %v144_v28 }
 0x12d   :  { %v153_v29 = vpop.eup %152 }
 0x12e   :  { %v107_v30 = vadd.f32 1.0, %v153_v29 }
 0x130   :  { %154 = vrcp.f32 %v107_v30  ;;  %v119_v34 = vand.u32 2147483648, %v107_v30  ;;  %v117_v36 = vand.u32 2147483647, %v107_v30  ;;  %vm113_vm6 = vweird.f32 %v107_v30 }
 0x132   :  { %v120_v38 = vor.u32 1.1754944e-38, %v119_v34  ;;  %vm118_vm9 = vcmp.eq.f32.partialorder %v117_v36, 8.507059e+37 }
 0x136   :  { %v155_v31 = vpop.eup %154 }
 0x137   :  { %v109_v32 = vmul.f32 %v155_v31, %v107_v30  ;;  %vm114_vm5 = vweird.f32 %v155_v31 }
 0x138   :  { %vm115_vm7 = vmor %vm113_vm6, %vm114_vm5 }
 0x139   :  { %v110_v33 = vsub.f32 1.0, %v109_v32 }
 0x13b   :  { %v111_v35 = vmul.f32 %v155_v31, %v110_v33 }
 0x13d   :  { %v112_v37 = vadd.f32 %v155_v31, %v111_v35 }
 0x13f   :  { %v116_v39 = vsel %vm115_vm7, %v155_v31, %v112_v37 }
 0x140   :  { %v121_v40 = vsel %vm118_vm9, %v120_v38, %v116_v39 }
 0x141   :  { %124 = vst.msk [vmem:[#allocation2] sm:$0x3] %vm123_vm8, %v121_v40 }
 0x142   :  { %135 = dma.vmem_to_hbm [thread:$0]  %s131_s12, 32, %s133_s4, [#allocation3]  }
 0x143   :  { %180 = dma.done.wait [#allocation3], 32  }
 0x144   :  { %181 = vsyncadd [#allocation3], 4294967264 }
 0x145   :  { %140 = vsyncpa [#allocation3], 1 }

</bundles_post_ra>
